<compile_context>
chip_gen: v5e
topology: v5e:2x2
jax: 0.10.0
libtpu: 0.0.40
codegen_flags: <defaults>
</compile_context>

<pallas_src>
import functools

import jax
import jax.numpy as jnp
from jax.experimental import pallas as pl
from jax.experimental.pallas import tpu as pltpu


def _round_up(x: int, m: int) -> int:
    return (x + m - 1) // m * m


def _split_lane_tile(t: int) -> int:
    """Largest multiple of 128 that strictly divides t (t itself if t == 128)."""
    best = t
    for c in range(128, t, 128):
        if t % c == 0:
            best = c
    return best


def _lora_linear_kernel(x_ref, w_ref, b_ref, xa_ref, bm_ref, o_ref, acc_ref):
    """One (tm, tn) output tile; grid axis 2 is the K reduction (innermost)."""
    k = pl.program_id(2)

    @pl.when(k == 0)
    def _prologue():
        # Fold bias + LoRA combine (B is pre-scaled by alpha) into the
        # accumulator init so it overlaps with the K-loop pipeline instead of
        # stacking MXU drain + VPU + store at the tail of every output tile.
        acc_ref[...] = (
            b_ref[...].astype(jnp.float32)
            + jnp.dot(xa_ref[...], bm_ref[...], preferred_element_type=jnp.float32)
        )

    # Base matmul partial sum for this K slab (MXU, f32 accumulation).
    acc_ref[...] += jnp.dot(x_ref[...], w_ref[...],
                            preferred_element_type=jnp.float32)

    @pl.when(k == pl.num_programs(2) - 1)
    def _epilogue():
        o_ref[...] = acc_ref[...].astype(o_ref.dtype)


def prepare_lora_linear(w_t, bias, a, b, alpha, *,
                        compute_dtype=jnp.bfloat16, tn=1024, tk=1024):
    """One-time preprocessing of the frozen parameters.

    w_t: (K, N) = torch weight (out, in) transposed; bias: (N,);
    a: (K, r); b: (r, N). Returns a dict consumed by `linear_with_lora`.
    """
    assert tn % 128 == 0 and tk % 128 == 0
    K, N = w_t.shape
    r = a.shape[1]

    tn_e = min(tn, _round_up(N, 128))
    tk_e = min(tk, _round_up(K, 128))
    N_p = _round_up(N, tn_e)
    K_p = _round_up(K, tk_e)

    wd = compute_dtype if compute_dtype is not None else w_t.dtype
    w_p = jnp.pad(w_t.astype(wd), ((0, K_p - K), (0, N_p - N)))
    bias_p = jnp.pad(bias.reshape(1, N).astype(jnp.float32), ((0, 0), (0, N_p - N)))
    # alpha folded into the frozen B once; LoRA dot in-kernel needs no scale.
    b_scaled = (float(alpha) * b.astype(jnp.float32)).astype(wd)
    b_p = jnp.pad(b_scaled, ((0, 0), (0, N_p - N)))

    return dict(w=w_p, bias=bias_p, a=a, b=b_p,
                K=K, N=N, K_p=K_p, N_p=N_p,
                tn=tn_e, tk=tk_e, rank=r, compute_dtype=compute_dtype)


def linear_with_lora(x, params, *, tm=512):
    """y = x @ W^T + bias + alpha * ((x @ A) @ B), with frozen params prepared."""
    K, N = params["K"], params["N"]
    K_p, N_p = params["K_p"], params["N_p"]
    tn_e, tk_e = params["tn"], params["tk"]
    r = params["rank"]
    cdt = params["compute_dtype"]
    out_dtype = x.dtype

    orig_shape = x.shape
    x2 = x.reshape(-1, K)
    M = x2.shape[0]

    # Hoist the rank-r projection out of the K loop (tiny: O(M*K*r) flops).
    xa = jnp.dot(x2.astype(jnp.float32), params["a"].astype(jnp.float32),
                 preferred_element_type=jnp.float32)

    if cdt is not None:
        x2 = x2.astype(cdt)   # bf16 MXU inputs; f32 accumulation in scratch.
        xa = xa.astype(cdt)

    # bf16 packs 16 rows per sublane group -> clamp tm to multiples of 16.
    sub = 16 if cdt == jnp.bfloat16 else 8
    tm_e = min(tm, _round_up(M, sub))
    M_p = _round_up(M, tm_e)

    # v7x megacore: make sure at least one "parallel" axis has >= 2 blocks.
    tn_run = tn_e
    if M_p // tm_e == 1 and N_p // tn_run == 1:
        tn_run = _split_lane_tile(tn_e)

    # Only the activation-side tensors are padded per call.
    x2p = jnp.pad(x2, ((0, M_p - M), (0, K_p - K)))
    xa_p = jnp.pad(xa, ((0, M_p - M), (0, 0)))

    grid = (M_p // tm_e, N_p // tn_run, K_p // tk_e)

    out = pl.pallas_call(
        _lora_linear_kernel,
        out_shape=jax.ShapeDtypeStruct((M_p, N_p), out_dtype),
        grid_spec=pltpu.PrefetchScalarGridSpec(
            num_scalar_prefetch=0,
            grid=grid,
            in_specs=[
                pl.BlockSpec((tm_e, tk_e), lambda i, j, k: (i, k)),   # x tile
                pl.BlockSpec((tk_e, tn_run), lambda i, j, k: (k, j)),  # W (K, N) tile
                pl.BlockSpec((1, tn_run), lambda i, j, k: (0, j)),     # bias tile
                pl.BlockSpec((tm_e, r), lambda i, j, k: (i, 0)),       # xa = x @ A
                pl.BlockSpec((r, tn_run), lambda i, j, k: (0, j)),     # alpha * B tile
            ],
            out_specs=pl.BlockSpec((tm_e, tn_run), lambda i, j, k: (i, j)),
            scratch_shapes=[pltpu.VMEM((tm_e, tn_run), jnp.float32)],
        ),
        compiler_params=pltpu.CompilerParams(
            dimension_semantics=("parallel", "parallel", "arbitrary"),
            # ~13 MiB actually used at default tiles (bf16, 512x1024x1024);
            # 48 MiB stays under v7x's 64 MiB physical VMEM per TensorCore
            # while leaving headroom on v5e/v6e (128 MiB).
            vmem_limit_bytes=48 * 1024 * 1024,
        ),
    )(x2p, params["w"], params["bias"], xa_p, params["b"])

    return out[:M, :N].reshape(*orig_shape[:-1], N)


if __name__ == "__main__":
    # Small shapes consistent with the module's forward:
    #   fan_in = 32, fan_out = 64, rank = 4, alpha = 2, x: (batch=2, seq=8, 32)
    batch, seq, fan_in, fan_out, rank, alpha = 2, 8, 32, 64, 4, 2

    key = jax.random.PRNGKey(0)
    kx, kw, kb, ka, kbm = jax.random.split(key, 5)

    x = jax.random.normal(kx, (batch, seq, fan_in), dtype=jnp.float32)

    # Frozen linear parameters (torch stores weight (out, in); passed transposed).
    w_t = jax.random.normal(kw, (fan_in, fan_out), dtype=jnp.float32) * (fan_in ** -0.5)
    bias = jax.random.normal(kb, (fan_out,), dtype=jnp.float32) * 0.1

    # LoRA factors. The module initializes B to zeros (LoRA starts as a no-op);
    # use a random B here so the LoRA path is numerically exercised.
    A = jax.random.normal(ka, (fan_in, rank), dtype=jnp.float32) * (rank ** -0.5)
    B = jax.random.normal(kbm, (rank, fan_out), dtype=jnp.float32) * 0.1

    # Pure-JAX reference.
    ref = x @ w_t + bias + alpha * ((x @ A) @ B)

    # f32 path (compute_dtype=None): exact parity with the reference.
    params_f32 = prepare_lora_linear(w_t, bias, A, B, alpha, compute_dtype=None)
    y = jax.block_until_ready(linear_with_lora(x, params_f32))
    assert y.shape == (batch, seq, fan_out)
    assert jnp.allclose(y, ref, atol=1e-4, rtol=1e-4), "f32 mismatch vs reference"

    # Default bf16 MXU path (all generations): f32 accumulation, looser parity.
    params_bf16 = prepare_lora_linear(w_t, bias, A, B, alpha)  # bf16 default
    y_bf16 = jax.block_until_ready(linear_with_lora(x, params_bf16))
    assert y_bf16.shape == (batch, seq, fan_out)
    assert jnp.allclose(y_bf16, ref, atol=0.15, rtol=0.05), "bf16 path too far off"

    print("KERNEL_OK")
</pallas_src>

<mosaic_0001>
module attributes {stable_mosaic.version = 11 : i64} {
  func.func @_lora_linear_kernel(%arg0: i32, %arg1: i32, %arg2: i32, %arg3: memref<16x128xf32, #tpu.memory_space<vmem>>, %arg4: memref<128x128xf32, #tpu.memory_space<vmem>>, %arg5: memref<1x128xf32, #tpu.memory_space<vmem>>, %arg6: memref<16x4xf32, #tpu.memory_space<vmem>>, %arg7: memref<4x128xf32, #tpu.memory_space<vmem>>, %arg8: memref<16x128xf32, #tpu.memory_space<vmem>>, %arg9: memref<16x128xf32, #tpu.memory_space<vmem>>) attributes {dimension_semantics = [#tpu.dimension_semantics<parallel>, #tpu.dimension_semantics<parallel>, #tpu.dimension_semantics<arbitrary>], iteration_bounds = array<i64: 1, 1, 1>, scalar_prefetch = 0 : i64, scratch_operands = 1 : i64, tpu.core_type = #tpu.core_type<tc>, window_params = [{transform_indices = @transform_0, window_bounds = array<i64: 16, 128>}, {transform_indices = @transform_1, window_bounds = array<i64: 128, 128>}, {transform_indices = @transform_2, window_bounds = array<i64: 1, 128>}, {transform_indices = @transform_3, window_bounds = array<i64: 16, 4>}, {transform_indices = @transform_4, window_bounds = array<i64: 4, 128>}, {transform_indices = @transform_5, window_bounds = array<i64: 16, 128>}]} {
    %c0_i32 = arith.constant 0 : i32
    %0 = arith.cmpi eq, %arg2, %c0_i32 : i32
    %1 = arith.extui %0 : i1 to i32
    %c0_i32_0 = arith.constant 0 : i32
    %2 = arith.cmpi ne, %1, %c0_i32_0 : i32
    scf.if %2 {
      %c0_10 = arith.constant 0 : index
      %c0_11 = arith.constant 0 : index
      %12 = vector.load %arg5[%c0_10, %c0_11] : memref<1x128xf32, #tpu.memory_space<vmem>>, vector<1x128xf32>
      %c0_12 = arith.constant 0 : index
      %c0_13 = arith.constant 0 : index
      %13 = vector.load %arg6[%c0_12, %c0_13] : memref<16x4xf32, #tpu.memory_space<vmem>>, vector<16x4xf32>
      %c0_14 = arith.constant 0 : index
      %c0_15 = arith.constant 0 : index
      %14 = vector.load %arg7[%c0_14, %c0_15] : memref<4x128xf32, #tpu.memory_space<vmem>>, vector<4x128xf32>
      %cst_16 = arith.constant dense<0.000000e+00> : vector<16x128xf32>
      %15 = tpu.matmul %13, %14, %cst_16 {dimension_numbers = #tpu.dot_dimension_numbers<[1], [0], [0], [1], [0, 0, 1, 1], [], []>} : vector<16x4xf32>, vector<4x128xf32>, vector<16x128xf32> -> vector<16x128xf32>
      %16 = vector.broadcast %12 : vector<1x128xf32> to vector<16x128xf32>
      %17 = arith.addf %16, %15 : vector<16x128xf32>
      %c0_17 = arith.constant 0 : index
      %c0_18 = arith.constant 0 : index
      %18 = vector.load %arg9[%c0_17, %c0_18] : memref<16x128xf32, #tpu.memory_space<vmem>>, vector<16x128xf32>
      tpu.vector_store %arg9[%c0_17, %c0_18], %17 {strides = array<i32>} : memref<16x128xf32, #tpu.memory_space<vmem>>, vector<16x128xf32>,
    } else {
    }
    %c0 = arith.constant 0 : index
    %c0_1 = arith.constant 0 : index
    %3 = vector.load %arg9[%c0, %c0_1] : memref<16x128xf32, #tpu.memory_space<vmem>>, vector<16x128xf32>
    %c0_2 = arith.constant 0 : index
    %c0_3 = arith.constant 0 : index
    %4 = vector.load %arg3[%c0_2, %c0_3] : memref<16x128xf32, #tpu.memory_space<vmem>>, vector<16x128xf32>
    %c0_4 = arith.constant 0 : index
    %c0_5 = arith.constant 0 : index
    %5 = vector.load %arg4[%c0_4, %c0_5] : memref<128x128xf32, #tpu.memory_space<vmem>>, vector<128x128xf32>
    %cst = arith.constant dense<0.000000e+00> : vector<16x128xf32>
    %6 = tpu.matmul %4, %5, %cst {dimension_numbers = #tpu.dot_dimension_numbers<[1], [0], [0], [1], [0, 0, 1, 1], [], []>} : vector<16x128xf32>, vector<128x128xf32>, vector<16x128xf32> -> vector<16x128xf32>
    %7 = arith.addf %3, %6 : vector<16x128xf32>
    %c0_6 = arith.constant 0 : index
    %c0_7 = arith.constant 0 : index
    %8 = vector.load %arg9[%c0_6, %c0_7] : memref<16x128xf32, #tpu.memory_space<vmem>>, vector<16x128xf32>
    tpu.vector_store %arg9[%c0_6, %c0_7], %7 {strides = array<i32>} : memref<16x128xf32, #tpu.memory_space<vmem>>, vector<16x128xf32>,
    %c0_i32_8 = arith.constant 0 : i32
    %9 = arith.cmpi eq, %arg2, %c0_i32_8 : i32
    %10 = arith.extui %9 : i1 to i32
    %c0_i32_9 = arith.constant 0 : i32
    %11 = arith.cmpi ne, %10, %c0_i32_9 : i32
    scf.if %11 {
      %c0_10 = arith.constant 0 : index
      %c0_11 = arith.constant 0 : index
      %12 = vector.load %arg9[%c0_10, %c0_11] : memref<16x128xf32, #tpu.memory_space<vmem>>, vector<16x128xf32>
      %c0_12 = arith.constant 0 : index
      %c0_13 = arith.constant 0 : index
      %13 = vector.load %arg8[%c0_12, %c0_13] : memref<16x128xf32, #tpu.memory_space<vmem>>, vector<16x128xf32>
      tpu.vector_store %arg8[%c0_12, %c0_13], %12 {strides = array<i32>} : memref<16x128xf32, #tpu.memory_space<vmem>>, vector<16x128xf32>,
    } else {
    }
    return
  }
  func.func @transform_0(%arg0: i32, %arg1: i32, %arg2: i32) -> (i32, i32) {
    %c0_i32 = arith.constant 0 : i32
    return %arg0, %arg2 : i32, i32
  }
  func.func @transform_1(%arg0: i32, %arg1: i32, %arg2: i32) -> (i32, i32) {
    %c0_i32 = arith.constant 0 : i32
    return %arg2, %arg1 : i32, i32
  }
  func.func @transform_2(%arg0: i32, %arg1: i32, %arg2: i32) -> (i32, i32) {
    %c0_i32 = arith.constant 0 : i32
    %c0_i32_0 = arith.constant 0 : i32
    return %c0_i32, %arg1 : i32, i32
  }
  func.func @transform_3(%arg0: i32, %arg1: i32, %arg2: i32) -> (i32, i32) {
    %c0_i32 = arith.constant 0 : i32
    %c0_i32_0 = arith.constant 0 : i32
    return %arg0, %c0_i32 : i32, i32
  }
  func.func @transform_4(%arg0: i32, %arg1: i32, %arg2: i32) -> (i32, i32) {
    %c0_i32 = arith.constant 0 : i32
    %c0_i32_0 = arith.constant 0 : i32
    return %c0_i32, %arg1 : i32, i32
  }
  func.func @transform_5(%arg0: i32, %arg1: i32, %arg2: i32) -> (i32, i32) {
    %c0_i32 = arith.constant 0 : i32
    return %arg0, %arg1 : i32, i32
  }
}

</mosaic_0001>

<bundles_post_ra>
// kernel: tpu_custom_call.1
= control target key start
LH: loop header
LB: loop body
LE: loop exit
PB: predicated region body
PF: predicated region fallthrough
CT: control target
= control target key end

     0   :  { %10 = vsyncpa [#allocation4], 0  ;;  %s301_s0 = inlined_call_operand.vmem [shape: f32[16,128], index: 0, kind: input, shape index: {}]   ;;  %s302_s1 = inlined_call_operand.hbm [shape: f32[128,128], index: 1, kind: input, shape index: {}]   ;;  %s303_s2 = inlined_call_operand.vmem [shape: f32[1,128], index: 2, kind: input, shape index: {}]   ;;  %s304_s3 = inlined_call_operand.vmem [shape: f32[16,4], index: 3, kind: input, shape index: {}]   ;;  %s305_s4 = inlined_call_operand.vmem [shape: f32[4,128], index: 4, kind: input, shape index: {}]   ;;  %s306_s5 = inlined_call_operand.hbm [shape: f32[16,128], index: 5, kind: output, shape index: {}]  }
   0x1   :  { %11 = vsyncpa [#allocation5], 0  ;;  %s18_s20 = sshll.u32 %s302_s1, 4  ;;  %s235_s21 = smov [#allocation3]   ;;  %s19_s20 = int_to_ptr.hbm [resolvable:$true] %s18_s20 }
   0x2   :  { %s20_s22 = sshll.u32 %s235_s21, 4  ;;  %s236_s23 = smov 128   ;;  %s21_s22 = int_to_ptr.vmem [resolvable:$true] %s20_s22 }
   0x3   :  { %s237_s24 = smov 8  }
   0x4   :  { %26 = dma.hbm_to_vmem [thread:$0]  %s19_s20, 2048, %s21_s22, [#allocation4], %s236_s23, %s236_s23, %s237_s24  }
   0x5   :  { %231 = dma.done.wait [#allocation4], 2048  }
   0x6   :  { %232 = vsyncadd [#allocation4], 4294965248  ;;  %v105_v0 = vld [vmem:[#allocation3 + $0x78] sm:$0xff]  ;;  %v104_v1 = vld [vmem:[#allocation3 + $0x70] sm:$0xff]  ;;  %vm52_vm0 = vcmask 1043456   ;;  %vm45_vm1 = vcmask 31744  }
   0x7   :  { %106 = vmatpush.msra.mxu1 %v105_v0  ;;  %162 = vmatpush.msra.mxu2 %v105_v0  ;;  %v103_v2 = vld [vmem:[#allocation3 + $0x68] sm:$0xff]  ;;  %v102_v3 = vld [vmem:[#allocation3 + $0x60] sm:$0xff]  ;;  %v101_v6 = vld [vmem:[#allocation3 + $0x58] sm:$0xff]  ;;  %s238_s9 = smov [#allocation6]  }
   0x8   :  { %v44_v4 = vld [vmem:[%s305_s4] sm:$0xf]  ;;  %v100_v7 = vld [vmem:[#allocation3 + $0x50] sm:$0xff]  ;;  %v99_v8 = vld [vmem:[#allocation3 + $0x48] sm:$0xff]  ;;  %s144_s10 = sshll.u32 %s238_s9, 4  ;;  %s145_s10 = int_to_ptr.vmem [resolvable:$true] %s144_s10 }
   0x9   :  { %107 = vmatpush.msra.mxu1 %v104_v1  ;;  %163 = vmatpush.msra.mxu2 %v104_v1  ;;  %v42_v5 = vld [vmem:[%s304_s3] sm:$0xff]  ;;  %v43_v10 = vld [vmem:[%s304_s3 + $0x8] sm:$0xff]  ;;  %v97_v11 = vld [vmem:[#allocation3 + $0x38] sm:$0xff] }
   0xa   :  { %159 = vmatpush.msk.msra.mxu0 %vm52_vm0, %v44_v4  ;;  %v98_v9 = vld [vmem:[#allocation3 + $0x40] sm:$0xff]  ;;  %v96_v12 = vld [vmem:[#allocation3 + $0x30] sm:$0xff]  ;;  %v95_v13 = vld [vmem:[#allocation3 + $0x28] sm:$0xff] }
   0xb   :  { %108 = vmatpush.msra.mxu1 %v103_v2  ;;  %164 = vmatpush.msra.mxu2 %v103_v2  ;;  %v94_v14 = vld [vmem:[#allocation3 + $0x20] sm:$0xff]  ;;  %v93_v15 = vld [vmem:[#allocation3 + $0x18] sm:$0xff]  ;;  %v92_v16 = vld [vmem:[#allocation3 + $0x10] sm:$0xff] }
   0xc   :  { %160 = vmatmul.msk.f32.vlgmr.msra.gmra.mxu0 %vm45_vm1, %v42_v5  ;;  %v91_v17 = vld [vmem:[#allocation3 + $0x8] sm:$0xff]  ;;  %v90_v18 = vld [vmem:[#allocation3] sm:$0xff] }
   0xd   :  { %109 = vmatpush.msra.mxu1 %v102_v3  ;;  %165 = vmatpush.msra.mxu2 %v102_v3  ;;  %v88_v19 = vld [vmem:[%s301_s0] sm:$0xff]  ;;  %v89_v20 = vld [vmem:[%s301_s0 + $0x8] sm:$0xff]  ;;  %s146_s0 = sshll.u32 %s306_s5, 4  ;;  %s147_s0 = int_to_ptr.hbm [resolvable:$true] %s146_s0 }
   0xe   :  { %v182_v22 = vld [vmem:[%s303_s2] ss:$0 sm:$0xff] }
   0xf   :  { %110 = vmatpush.msra.mxu1 %v101_v6  ;;  %166 = vmatpush.msra.mxu2 %v101_v6 }
  0x11   :  { %111 = vmatpush.msra.mxu1 %v100_v7  ;;  %167 = vmatpush.msra.mxu2 %v100_v7 }
  0x13   :  { %112 = vmatpush.msra.mxu1 %v99_v8  ;;  %168 = vmatpush.msra.mxu2 %v99_v8 }
  0x14   :  { %161 = vmatmul.msk.f32.gmra.mxu0 %vm45_vm1, %v43_v10 }
  0x15   :  { %113 = vmatpush.msra.mxu1 %v98_v9  ;;  %169 = vmatpush.msra.mxu2 %v98_v9 }
  0x17   :  { %114 = vmatpush.msra.mxu1 %v97_v11  ;;  %170 = vmatpush.msra.mxu2 %v97_v11 }
  0x19   :  { %115 = vmatpush.msra.mxu1 %v96_v12  ;;  %171 = vmatpush.msra.mxu2 %v96_v12 }
  0x1b   :  { %116 = vmatpush.msra.mxu1 %v95_v13  ;;  %172 = vmatpush.msra.mxu2 %v95_v13 }
  0x1d   :  { %117 = vmatpush.msra.mxu1 %v94_v14  ;;  %173 = vmatpush.msra.mxu2 %v94_v14 }
  0x1f   :  { %118 = vmatpush.msra.mxu1 %v93_v15  ;;  %174 = vmatpush.msra.mxu2 %v93_v15 }
  0x21   :  { %119 = vmatpush.msra.mxu1 %v92_v16  ;;  %175 = vmatpush.msra.mxu2 %v92_v16 }
  0x23   :  { %120 = vmatpush.msra.mxu1 %v91_v17  ;;  %176 = vmatpush.msra.mxu2 %v91_v17 }
  0x25   :  { %121 = vmatpush.msra.mxu1 %v90_v18  ;;  %177 = vmatpush.msra.mxu2 %v90_v18 }
  0x26   :  { %122 = vmatmul.f32.vlgmr.msra.gmra.mxu1 %v88_v19  ;;  %125 = vmatmul.f32.vlgmr.msra.gmra.mxu2 %v89_v20 }
  0x89   :  { %v73_v21 = vpop.f32.mrf.mxu0 }
  0x8a   :  { %v82_v23 = vadd.f32 %v182_v22, %v73_v21 }
  0x91   :  { %v76_v25 = vpop.f32.mrf.mxu0 }
  0x92   :  { %v83_v27 = vadd.f32 %v182_v22, %v76_v25 }
  0xa3   :  { %v123_v24 = vpop.f32.mrf.mxu1 }
  0xa4   :  { %v129_v26 = vadd.f32 %v123_v24, %v82_v23 }
  0xa6   :  { %138 = vst [vmem:[#allocation6] sm:$0xff] %v129_v26 }
  0xa9   :  { %v126_v28 = vpop.f32.mrf.mxu2 }
  0xaa   :  { %v130_v29 = vadd.f32 %v126_v28, %v83_v27 }
  0xac   :  { %139 = vst [vmem:[#allocation6 + $0x8] sm:$0xff] %v130_v29 }
  0xad   :  { %152 = dma.vmem_to_hbm [thread:$0]  %s145_s10, 256, %s147_s0, [#allocation5], %s236_s23, %s236_s23, %s237_s24  }
  0xae   :  { %233 = dma.done.wait [#allocation5], 256  }
  0xaf   :  { %234 = vsyncadd [#allocation5], 4294967040 }
  0xb0   :  { %157 = vsyncpa [#allocation4], 1 }
  0xb1   :  { %158 = vsyncpa [#allocation5], 1 }

</bundles_post_ra>
